<compile_context>
chip_gen: v5e
topology: v5e:2x2
jax: 0.10.0
libtpu: 0.0.40
codegen_flags: <defaults>
</compile_context>

<pallas_src>
import jax
import jax.numpy as jnp
from jax.experimental import pallas as pl
from jax.experimental.pallas import tpu as pltpu


def _maxpool3x3s2_kernel(ee_ref, eo_ref, oe_ref, oo_ref, o_ref):
    # Refs are spatial-major with the fused batch*channel axis on lanes:
    #   ee_ref: (Ho+1, Wo+1, TB)  input at (even row, even col)
    #   eo_ref: (Ho+1, Wo,   TB)  input at (even row, odd  col)
    #   oe_ref: (Ho,   Wo+1, TB)  input at (odd  row, even col)
    #   oo_ref: (Ho,   Wo,   TB)  input at (odd  row, odd  col)
    #   o_ref : (Ho,   Wo,   TB)
    # Output (oh, ow) covers input rows {2oh, 2oh+1, 2oh+2} and cols
    # {2ow, 2ow+1, 2ow+2}; after the even/odd split every tap is a contiguous
    # static slice (offset 0 or 1) along the sublane/outer dims only.
    Ho, Wo, _ = o_ref.shape
    m = oo_ref[...]                                         # (odd row, odd col)
    for dh in range(2):                                     # (even row+dh, odd col)
        m = jnp.maximum(m, eo_ref[dh:dh + Ho, :, :])
    for dw in range(2):                                     # (odd row, even col+dw)
        m = jnp.maximum(m, oe_ref[:, dw:dw + Wo, :])
    for dh in range(2):                                     # (even row+dh, even col+dw)
        for dw in range(2):
            m = jnp.maximum(m, ee_ref[dh:dh + Ho, dw:dw + Wo, :])
    o_ref[...] = m


def _choose_lane_tile(B, Ho, Wo):
    """Pick a lane-axis tile: full B, or a multiple of 128 that fits VMEM."""
    if B % 128 != 0:
        return B  # block must equal the full axis when not a multiple of 128
    # Approx. f32 bytes per lane across all double-buffered blocks (inputs
    # over-approximated as (Ho+1)*(Wo+1) each, plus the output block).
    per_lane = 2 * (4 * (Ho + 1) * (Wo + 1) + Ho * Wo) * 4
    budget = 24 * 1024 * 1024  # stay inside v7x's 32 MiB default scoped VMEM
    tb = 128
    while (tb * 2 <= B and B % (tb * 2) == 0
           and (tb * 2) * per_lane <= budget and tb < 1024):
        tb *= 2
    # TODO(synk): for very large spatial extents with small B, also tile Ho
    # (needs element-offset row windows) instead of only shrinking the lane tile.
    return tb


def maxpool2d_k3_s2(x):
    """MaxPool2d(kernel_size=[3,3], stride=[2,2], padding=[0,0]) on NCHW f32."""
    N, C, H, W = x.shape
    Ho = (H - 3) // 2 + 1
    Wo = (W - 3) // 2 + 1
    assert Ho >= 1 and Wo >= 1, "input smaller than the 3x3 pooling window"
    B = N * C

    # Spatial-major layout (H, W, B): pooled dims on sublane/outer axes, the
    # purely elementwise B axis lane-dense.  Pure layout plumbing (XLA side).
    xt = jnp.transpose(x.reshape(B, H, W), (1, 2, 0))

    # Even/odd pre-split (pure layout): removes all stride-2 indexing from the
    # kernel; every in-kernel tap becomes a contiguous offset-0/1 slice.
    x_ee = xt[0:2 * Ho + 1:2, 0:2 * Wo + 1:2, :]   # (Ho+1, Wo+1, B)
    x_eo = xt[0:2 * Ho + 1:2, 1:2 * Wo:2, :]       # (Ho+1, Wo,   B)
    x_oe = xt[1:2 * Ho:2, 0:2 * Wo + 1:2, :]       # (Ho,   Wo+1, B)
    x_oo = xt[1:2 * Ho:2, 1:2 * Wo:2, :]           # (Ho,   Wo,   B)

    TB = _choose_lane_tile(B, Ho, Wo)
    grid = (B // TB,)

    def lane_map(i):
        return (0, 0, i)

    out = pl.pallas_call(
        _maxpool3x3s2_kernel,
        out_shape=jax.ShapeDtypeStruct((Ho, Wo, B), x.dtype),
        grid=grid,
        in_specs=[
            pl.BlockSpec((Ho + 1, Wo + 1, TB), lane_map),
            pl.BlockSpec((Ho + 1, Wo, TB), lane_map),
            pl.BlockSpec((Ho, Wo + 1, TB), lane_map),
            pl.BlockSpec((Ho, Wo, TB), lane_map),
        ],
        out_specs=pl.BlockSpec((Ho, Wo, TB), lane_map),
        compiler_params=pltpu.CompilerParams(
            dimension_semantics=("parallel",)),
    )(x_ee, x_eo, x_oe, x_oo)

    # Back to NCHW.
    return jnp.transpose(out, (2, 0, 1)).reshape(N, C, Ho, Wo)


def _check(x):
    out = jax.block_until_ready(jax.jit(maxpool2d_k3_s2)(x))
    ref = jax.lax.reduce_window(
        x, -jnp.inf, jax.lax.max,
        window_dimensions=(1, 1, 3, 3),
        window_strides=(1, 1, 2, 2),
        padding="VALID",
    )
    assert out.shape == ref.shape, (out.shape, ref.shape)
    assert jnp.allclose(out, ref), "mismatch vs reduce_window reference"


if __name__ == "__main__":
    key = jax.random.PRNGKey(0)

    # "Full dim indivisible by stride": H and W not divisible by stride 2.
    k1, k2 = jax.random.split(key)
    x1 = jax.random.normal(k1, (2, 4, 15, 17), dtype=jnp.float32)
    _check(x1)

    # Also exercise the lane-dense (B multiple of 128) tiling path.
    x2 = jax.random.normal(k2, (1, 128, 11, 9), dtype=jnp.float32)
    _check(x2)

    print("KERNEL_OK")
</pallas_src>

<mosaic_0001>
module attributes {stable_mosaic.version = 11 : i64} {
  func.func @_maxpool3x3s2_kernel(%arg0: i32, %arg1: memref<8x9x8xf32, #tpu.memory_space<vmem>>, %arg2: memref<8x8x8xf32, #tpu.memory_space<vmem>>, %arg3: memref<7x9x8xf32, #tpu.memory_space<vmem>>, %arg4: memref<7x8x8xf32, #tpu.memory_space<vmem>>, %arg5: memref<7x8x8xf32, #tpu.memory_space<vmem>>) attributes {dimension_semantics = [#tpu.dimension_semantics<parallel>], iteration_bounds = array<i64: 1>, scalar_prefetch = 0 : i64, scratch_operands = 0 : i64, tpu.core_type = #tpu.core_type<tc>, window_params = [{transform_indices = @transform_0, window_bounds = array<i64: 8, 9, 8>}, {transform_indices = @transform_1, window_bounds = array<i64: 8, 8, 8>}, {transform_indices = @transform_2, window_bounds = array<i64: 7, 9, 8>}, {transform_indices = @transform_3, window_bounds = array<i64: 7, 8, 8>}, {transform_indices = @transform_4, window_bounds = array<i64: 7, 8, 8>}]} {
    %c0 = arith.constant 0 : index
    %c0_0 = arith.constant 0 : index
    %c0_1 = arith.constant 0 : index
    %0 = vector.load %arg4[%c0, %c0_0, %c0_1] : memref<7x8x8xf32, #tpu.memory_space<vmem>>, vector<7x8x8xf32>
    %c0_2 = arith.constant 0 : index
    %c0_3 = arith.constant 0 : index
    %c0_4 = arith.constant 0 : index
    %1 = vector.load %arg2[%c0_2, %c0_3, %c0_4] : memref<8x8x8xf32, #tpu.memory_space<vmem>>, vector<7x8x8xf32>
    %2 = arith.maximumf %0, %1 : vector<7x8x8xf32>
    %c1 = arith.constant 1 : index
    %c0_5 = arith.constant 0 : index
    %c0_6 = arith.constant 0 : index
    %3 = vector.load %arg2[%c1, %c0_5, %c0_6] : memref<8x8x8xf32, #tpu.memory_space<vmem>>, vector<7x8x8xf32>
    %4 = arith.maximumf %2, %3 : vector<7x8x8xf32>
    %c0_7 = arith.constant 0 : index
    %c0_8 = arith.constant 0 : index
    %c0_9 = arith.constant 0 : index
    %5 = vector.load %arg3[%c0_7, %c0_8, %c0_9] : memref<7x9x8xf32, #tpu.memory_space<vmem>>, vector<7x8x8xf32>
    %6 = arith.maximumf %4, %5 : vector<7x8x8xf32>
    %c0_10 = arith.constant 0 : index
    %c1_11 = arith.constant 1 : index
    %c0_12 = arith.constant 0 : index
    %7 = vector.load %arg3[%c0_10, %c1_11, %c0_12] : memref<7x9x8xf32, #tpu.memory_space<vmem>>, vector<7x8x8xf32>
    %8 = arith.maximumf %6, %7 : vector<7x8x8xf32>
    %c0_13 = arith.constant 0 : index
    %c0_14 = arith.constant 0 : index
    %c0_15 = arith.constant 0 : index
    %9 = vector.load %arg1[%c0_13, %c0_14, %c0_15] : memref<8x9x8xf32, #tpu.memory_space<vmem>>, vector<7x8x8xf32>
    %10 = arith.maximumf %8, %9 : vector<7x8x8xf32>
    %c0_16 = arith.constant 0 : index
    %c1_17 = arith.constant 1 : index
    %c0_18 = arith.constant 0 : index
    %11 = vector.load %arg1[%c0_16, %c1_17, %c0_18] : memref<8x9x8xf32, #tpu.memory_space<vmem>>, vector<7x8x8xf32>
    %12 = arith.maximumf %10, %11 : vector<7x8x8xf32>
    %c1_19 = arith.constant 1 : index
    %c0_20 = arith.constant 0 : index
    %c0_21 = arith.constant 0 : index
    %13 = vector.load %arg1[%c1_19, %c0_20, %c0_21] : memref<8x9x8xf32, #tpu.memory_space<vmem>>, vector<7x8x8xf32>
    %14 = arith.maximumf %12, %13 : vector<7x8x8xf32>
    %c1_22 = arith.constant 1 : index
    %c1_23 = arith.constant 1 : index
    %c0_24 = arith.constant 0 : index
    %15 = vector.load %arg1[%c1_22, %c1_23, %c0_24] : memref<8x9x8xf32, #tpu.memory_space<vmem>>, vector<7x8x8xf32>
    %16 = arith.maximumf %14, %15 : vector<7x8x8xf32>
    %c0_25 = arith.constant 0 : index
    %c0_26 = arith.constant 0 : index
    %c0_27 = arith.constant 0 : index
    %17 = vector.load %arg5[%c0_25, %c0_26, %c0_27] : memref<7x8x8xf32, #tpu.memory_space<vmem>>, vector<7x8x8xf32>
    tpu.vector_store %arg5[%c0_25, %c0_26, %c0_27], %16 {strides = array<i32>} : memref<7x8x8xf32, #tpu.memory_space<vmem>>, vector<7x8x8xf32>,
    return
  }
  func.func @transform_0(%arg0: i32) -> (i32, i32, i32) {
    %c0_i32 = arith.constant 0 : i32
    %c0_i32_0 = arith.constant 0 : i32
    %c0_i32_1 = arith.constant 0 : i32
    return %c0_i32, %c0_i32_0, %arg0 : i32, i32, i32
  }
  func.func @transform_1(%arg0: i32) -> (i32, i32, i32) {
    %c0_i32 = arith.constant 0 : i32
    %c0_i32_0 = arith.constant 0 : i32
    %c0_i32_1 = arith.constant 0 : i32
    return %c0_i32, %c0_i32_0, %arg0 : i32, i32, i32
  }
  func.func @transform_2(%arg0: i32) -> (i32, i32, i32) {
    %c0_i32 = arith.constant 0 : i32
    %c0_i32_0 = arith.constant 0 : i32
    %c0_i32_1 = arith.constant 0 : i32
    return %c0_i32, %c0_i32_0, %arg0 : i32, i32, i32
  }
  func.func @transform_3(%arg0: i32) -> (i32, i32, i32) {
    %c0_i32 = arith.constant 0 : i32
    %c0_i32_0 = arith.constant 0 : i32
    %c0_i32_1 = arith.constant 0 : i32
    return %c0_i32, %c0_i32_0, %arg0 : i32, i32, i32
  }
  func.func @transform_4(%arg0: i32) -> (i32, i32, i32) {
    %c0_i32 = arith.constant 0 : i32
    %c0_i32_0 = arith.constant 0 : i32
    %c0_i32_1 = arith.constant 0 : i32
    return %c0_i32, %c0_i32_0, %arg0 : i32, i32, i32
  }
}

</mosaic_0001>

<bundles_post_ra>
// kernel: maxpool2d_k3_s2.1
= control target key start
LH: loop header
LB: loop body
LE: loop exit
PB: predicated region body
PF: predicated region fallthrough
CT: control target
= control target key end

     0   :  { %vm138_vm0 = vcmask 64512   ;;  %s359_s1 = inlined_call_operand.vmem [shape: f32[8,8,8], index: 1, kind: input, shape index: {}]   ;;  %s360_s2 = inlined_call_operand.vmem [shape: f32[7,9,8], index: 2, kind: input, shape index: {}]   ;;  %s361_s3 = inlined_call_operand.vmem [shape: f32[7,8,8], index: 3, kind: input, shape index: {}]   ;;  %s362_s0 = inlined_call_operand.vmem [shape: f32[8,9,8], index: 0, kind: input, shape index: {}]   ;;  %s363_s4 = inlined_call_operand.vmem [shape: f32[7,8,8], index: 4, kind: output, shape index: {}]  }
   0x1   :  { %v17_v0 = vld [vmem:[%s361_s3] sm:$0xff]  ;;  %v150_v3 = vld [vmem:[%s359_s1 + $0x8] sm:$0xff]  ;;  %v151_v7 = vld [vmem:[%s359_s1 + $0x10] sm:$0xff] }
   0x2   :  { %v24_v1 = vld [vmem:[%s359_s1] sm:$0xff]  ;;  %v18_v6 = vld [vmem:[%s361_s3 + $0x8] sm:$0xff]  ;;  %v54_v11 = vld [vmem:[%s360_s2 + $0x10] sm:$0xff] }
   0x3   :  { %v31_v2 = vmax.f32 %v17_v0, %v24_v1  ;;  %v53_v4 = vld [vmem:[%s360_s2] sm:$0xff]  ;;  %v32_v9 = vmax.f32 %v18_v6, %v150_v3  ;;  %v19_v12 = vld [vmem:[%s361_s3 + $0x10] sm:$0xff]  ;;  %v152_v13 = vld [vmem:[%s359_s1 + $0x18] sm:$0xff] }
   0x4   :  { %v67_v8 = vld [vmem:[%s360_s2 + $0x1] sm:$0xff]  ;;  %v68_v16 = vld [vmem:[%s360_s2 + $0x11] sm:$0xff]  ;;  %v33_v17 = vmax.f32 %v19_v12, %v151_v7 }
   0x5   :  { %v46_v5 = vmax.f32 %v31_v2, %v150_v3  ;;  %v81_v14 = vld [vmem:[%s362_s0] sm:$0xff]  ;;  %v47_v15 = vmax.f32 %v32_v9, %v151_v7  ;;  %v20_v20 = vld [vmem:[%s361_s3 + $0x18] sm:$0xff]  ;;  %v157_v23 = vld [vmem:[%s362_s0 + $0x10] sm:$0xff] }
   0x6   :  { %v55_v19 = vld [vmem:[%s360_s2 + $0x20] sm:$0xff]  ;;  %v48_v25 = vmax.f32 %v33_v17, %v152_v13  ;;  %v34_v26 = vmax.f32 %v20_v20, %v152_v13  ;;  %v56_v29 = vld [vmem:[%s360_s2 + $0x30] sm:$0xff]  ;;  %v154_v37 = vld [vmem:[%s359_s1 + $0x28] sm:$0xff] }
   0x7   :  { %v60_v10 = vmax.f32 %v46_v5, %v53_v4  ;;  %v153_v21 = vld [vmem:[%s359_s1 + $0x20] sm:$0xff]  ;;  %v61_v24 = vmax.f32 %v47_v15, %v54_v11  ;;  %v164_v31 = vld [vmem:[%s362_s0 + $0x11] sm:$0xff]  ;;  %v22_v41 = vld [vmem:[%s361_s3 + $0x28] sm:$0xff] }
   0x8   :  { %v95_v22 = vld [vmem:[%s362_s0 + $0x1] sm:$0xff]  ;;  %v62_v34 = vmax.f32 %v48_v25, %v55_v19  ;;  %v49_v35 = vmax.f32 %v34_v26, %v153_v21  ;;  %v70_v39 = vld [vmem:[%s360_s2 + $0x31] sm:$0xff]  ;;  %v36_v51 = vmax.f32 %v22_v41, %v154_v37 }
   0x9   :  { %v74_v18 = vmax.f32 %v60_v10, %v67_v8  ;;  %v69_v28 = vld [vmem:[%s360_s2 + $0x21] sm:$0xff]  ;;  %v75_v32 = vmax.f32 %v61_v24, %v68_v16  ;;  %v155_v47 = vld [vmem:[%s359_s1 + $0x30] sm:$0xff]  ;;  %v156_v58 = vld [vmem:[%s359_s1 + $0x38] sm:$0xff] }
   0xa   :  { %v21_v30 = vld [vmem:[%s361_s3 + $0x20] sm:$0xff]  ;;  %v76_v44 = vmax.f32 %v62_v34, %v69_v28  ;;  %v63_v45 = vmax.f32 %v49_v35, %v56_v29  ;;  %v159_v49 = vld [vmem:[%s362_s0 + $0x30] sm:$0xff]  ;;  %v51_v62 = vmax.f32 %v36_v51, %v155_v47 }
   0xb   :  { %v88_v27 = vmax.f32 %v74_v18, %v81_v14  ;;  %v158_v33 = vld [vmem:[%s362_s0 + $0x20] sm:$0xff]  ;;  %v35_v36 = vmax.f32 %v21_v30, %v153_v21  ;;  %v89_v42 = vmax.f32 %v75_v32, %v157_v23  ;;  %v23_v52 = vld [vmem:[%s361_s3 + $0x30] sm:$0xff] }
   0xc   :  { %v57_v40 = vld [vmem:[%s360_s2 + $0x40] sm:$0xff]  ;;  %v90_v54 = vmax.f32 %v76_v44, %v158_v33  ;;  %v77_v55 = vmax.f32 %v63_v45, %v70_v39  ;;  %v58_v57 = vld [vmem:[%s360_s2 + $0x50] sm:$0xff]  ;;  %v37_v63 = vmax.f32 %v23_v52, %v155_v47 }
   0xd   :  { %v102_v38 = vmax.f32 %v88_v27, %v95_v22  ;;  %v165_v43 = vld [vmem:[%s362_s0 + $0x21] sm:$0xff]  ;;  %v50_v46 = vmax.f32 %v35_v36, %v154_v37  ;;  %v103_v53 = vmax.f32 %v89_v42, %v164_v31  ;;  %v166_v60 = vld [vmem:[%s362_s0 + $0x31] sm:$0xff]  ;;  %v65_v7 = vmax.f32 %v51_v62, %v58_v57 }
   0xe   :  { %v71_v50 = vld [vmem:[%s360_s2 + $0x41] sm:$0xff]  ;;  %v104_v1 = vmax.f32 %v90_v54, %v165_v43  ;;  %v91_v2 = vmax.f32 %v77_v55, %v159_v49  ;;  %v72_v4 = vld [vmem:[%s360_s2 + $0x51] sm:$0xff]  ;;  %v52_v8 = vmax.f32 %v37_v63, %v156_v58 }
   0xf   :  { %v117_v48 = vmax.f32 %v102_v38, %v157_v23  ;;  %v64_v56 = vmax.f32 %v50_v46, %v57_v40  ;;  %v160_v61 = vld [vmem:[%s362_s0 + $0x40] sm:$0xff]  ;;  %v118_v0 = vmax.f32 %v103_v53, %v158_v33  ;;  %v161_v13 = vld [vmem:[%s362_s0 + $0x50] sm:$0xff]  ;;  %v79_v15 = vmax.f32 %v65_v7, %v72_v4 }
  0x10   :  { %v59_v5 = vld [vmem:[%s360_s2 + $0x60] sm:$0xff]  ;;  %v119_v10 = vmax.f32 %v104_v1, %v159_v49  ;;  %v105_v11 = vmax.f32 %v91_v2, %v166_v60  ;;  %v168_v20 = vld [vmem:[%s362_s0 + $0x51] sm:$0xff] }
  0x11   :  { %v131_v59 = vmax.f32 %v117_v48, %v164_v31  ;;  %v78_v3 = vmax.f32 %v64_v56, %v71_v50  ;;  %v167_v6 = vld [vmem:[%s362_s0 + $0x41] sm:$0xff]  ;;  %v132_v9 = vmax.f32 %v118_v0, %v165_v43  ;;  %v66_v16 = vmax.f32 %v52_v8, %v59_v5  ;;  %v163_v30 = vld [vmem:[%s362_s0 + $0x70] sm:$0xff] }
  0x12   :  { %v73_v14 = vld [vmem:[%s360_s2 + $0x61] sm:$0xff]  ;;  %v133_v17 = vmax.f32 %v119_v10, %v166_v60  ;;  %v120_v18 = vmax.f32 %v105_v11, %v160_v61  ;;  %v93_v22 = vmax.f32 %v79_v15, %v161_v13  ;;  %v170_v33 = vld [vmem:[%s362_s0 + $0x71] sm:$0xff] }
  0x13   :  { %139 = vst.msk [vmem:[%s363_s4] sm:$0xff] %vm138_vm0, %v131_v59  ;;  %v92_v12 = vmax.f32 %v78_v3, %v160_v61  ;;  %v162_v21 = vld [vmem:[%s362_s0 + $0x60] sm:$0xff]  ;;  %v80_v23 = vmax.f32 %v66_v16, %v73_v14 }
  0x14   :  { %140 = vst.msk [vmem:[%s363_s4 + $0x8] sm:$0xff] %vm138_vm0, %v132_v9  ;;  %v134_v24 = vmax.f32 %v120_v18, %v167_v6  ;;  %v169_v26 = vld [vmem:[%s362_s0 + $0x61] sm:$0xff]  ;;  %v107_v27 = vmax.f32 %v93_v22, %v168_v20 }
  0x15   :  { %v106_v19 = vmax.f32 %v92_v12, %v167_v6  ;;  %141 = vst.msk [vmem:[%s363_s4 + $0x10] sm:$0xff] %vm138_vm0, %v133_v17  ;;  %v94_v28 = vmax.f32 %v80_v23, %v162_v21 }
  0x16   :  { %142 = vst.msk [vmem:[%s363_s4 + $0x18] sm:$0xff] %vm138_vm0, %v134_v24  ;;  %v122_v31 = vmax.f32 %v107_v27, %v162_v21 }
  0x17   :  { %v121_v25 = vmax.f32 %v106_v19, %v161_v13  ;;  %v108_v32 = vmax.f32 %v94_v28, %v169_v26 }
  0x18   :  { %v136_v34 = vmax.f32 %v122_v31, %v169_v26 }
  0x19   :  { %v135_v29 = vmax.f32 %v121_v25, %v168_v20  ;;  %v123_v35 = vmax.f32 %v108_v32, %v163_v30 }
  0x1a   :  { %144 = vst.msk [vmem:[%s363_s4 + $0x28] sm:$0xff] %vm138_vm0, %v136_v34 }
  0x1b   :  { %143 = vst.msk [vmem:[%s363_s4 + $0x20] sm:$0xff] %vm138_vm0, %v135_v29  ;;  %v137_v36 = vmax.f32 %v123_v35, %v170_v33 }
  0x1d   :  { %145 = vst.msk [vmem:[%s363_s4 + $0x30] sm:$0xff] %vm138_vm0, %v137_v36 }

</bundles_post_ra>
